<compile_context>
chip_gen: v7x
topology: tpu7x:2x2x1
jax: 0.10.0
libtpu: 0.0.40
codegen_flags: <defaults>
</compile_context>

<pallas_src>
import functools

import jax
import jax.numpy as jnp
from jax.experimental import pallas as pl
from jax.experimental.pallas import tpu as pltpu


def _upsample_kernel(x_ref, dup_ref, o_ref, *, n_splits):
    """x_ref: (tm, W); dup_ref: (W, s*s*W) one-hot bf16; o_ref: (tm, s*s*W).

    Output column c of a block holds x[:, (c % (s*W)) // s]: the within-(s*W)
    stretching is the W duplication, the s repeats of that group are the
    duplicated H rows.
    """
    x = x_ref[...]
    dup = dup_ref[...]                                  # {0,1} in bf16 (exact)

    if n_splits == 1:
        # bf16 input: one native MXU pass is already an exact copy
        # (bf16 * 1.0 products are exact in the f32 accumulator).
        y = jnp.dot(x, dup, preferred_element_type=jnp.float32)
    else:
        # Exact copy of f32 / f16 / small-int data through the MXU:
        # split the f32 value into three bf16 addends (hi + mid + lo == x
        # exactly for normal floats), run three single-pass bf16 matmuls
        # against the 0/1 matrix and re-sum in f32.  Each partial product and
        # each add is exact, so no precision is lost (unlike a default-
        # precision f32 dot, which rounds operands to bf16).
        xf = x.astype(jnp.float32)
        hi = xf.astype(jnp.bfloat16)
        r1 = xf - hi.astype(jnp.float32)                # exact residual
        mid = r1.astype(jnp.bfloat16)
        lo = (r1 - mid.astype(jnp.float32)).astype(jnp.bfloat16)  # <= 7 bits: exact
        y = (jnp.dot(hi, dup, preferred_element_type=jnp.float32)
             + jnp.dot(mid, dup, preferred_element_type=jnp.float32)
             + jnp.dot(lo, dup, preferred_element_type=jnp.float32))

    o_ref[...] = y.astype(o_ref.dtype)


def _tiling(M, W, s, itemsize, n_splits):
    """Byte-based block sizing (review item): pick the row count per grid step
    so double-buffered in+out blocks, the resident one-hot and the f32 temps
    fit a ~10 MiB budget (under v5e's 16 MiB scoped-VMEM default), while
    keeping >= 4 grid steps (2 per v7x TensorCore) when there is enough work.
    """
    N = s * s * W
    in_row = W * itemsize
    out_row = N * itemsize
    tmp_row = (n_splits + 3) * W * 4 + 2 * N * 4        # split pieces + f32 temps (upper bound)
    per_row = 2 * (in_row + out_row) + tmp_row          # double-buffered blocks
    dup_bytes = 2 * W * N * 2                           # bf16 one-hot, double-buffered

    budget = 10 * 1024 * 1024
    avail = max(budget - dup_bytes, 32 * 1024)
    tm = max(8, (avail // per_row) // 8 * 8)

    if tm >= M:
        tm = M                                          # single full-extent block
    else:
        # Keep >= 4 grid steps (megacore on v7x) as long as each step still
        # writes >= ~1 MiB of output (amortizes the ~0.35 us per-step cost).
        while tm > 8 and pl.cdiv(M, tm) < 4 and (tm // 2) * out_row >= (1 << 20):
            tm = max(8, ((tm // 2) + 7) // 8 * 8)

    est = dup_bytes + per_row * min(tm, M) + (1 << 20)
    vmem_limit = None
    if est > 12 * 1024 * 1024:
        # Only for unusually large W; realistic shapes stay under the default.
        # TODO(synk): for very large W, add a second (column) grid axis instead
        # of raising the scoped-VMEM request.
        vmem_limit = int(min(est * 3 // 2, 48 * 1024 * 1024))
    return tm, vmem_limit


@functools.partial(jax.jit, static_argnames=("stride",))
def upsample_nearest(x, stride=2):
    """Pallas TPU implementation of the PyTorch `Upsample` module forward."""
    assert x.ndim == 4, "expected NCHW input"
    B, C, H, W = x.shape
    s = int(stride)
    if s == 1:
        return x

    M = B * C * H
    N = s * s * W
    dtype = x.dtype
    itemsize = jnp.dtype(dtype).itemsize

    # bf16 is exact with a single MXU pass; everything else goes through the
    # exact 3-way bf16 split (f32/f16 bit-exact, integers exact below 2**24).
    # TODO(synk): int32/int64 values with |v| >= 2**24 (and f64) are routed
    # through f32 and are not bit-exact, unlike PyTorch.
    n_splits = 1 if dtype == jnp.bfloat16 else 3

    x2 = x.reshape(M, W)                                # free collapse of NCHW

    # Hoisted one-hot duplication matrix: dup[j, c] = 1 iff (c % (s*W)) // s == j.
    cols = jnp.arange(N, dtype=jnp.int32)
    src = (cols % (s * W)) // s
    dup = (src[None, :] == jnp.arange(W, dtype=jnp.int32)[:, None]).astype(jnp.bfloat16)

    tm, vmem_limit = _tiling(M, W, s, itemsize, n_splits)
    grid = (pl.cdiv(M, tm),)

    cparams = dict(dimension_semantics=("parallel",))
    if vmem_limit is not None:
        cparams["vmem_limit_bytes"] = vmem_limit

    bytes_accessed = M * W * itemsize + M * N * itemsize + W * N * 2
    flops = n_splits * 2 * M * W * N                    # true (small) matmul flops

    kernel = functools.partial(_upsample_kernel, n_splits=n_splits)
    out2 = pl.pallas_call(
        kernel,
        out_shape=jax.ShapeDtypeStruct((M, N), dtype),
        grid=grid,
        in_specs=[
            pl.BlockSpec((tm, W), lambda i: (i, 0)),
            pl.BlockSpec((W, N), lambda i: (0, 0)),     # resident: fetched once
        ],
        out_specs=pl.BlockSpec((tm, N), lambda i: (i, 0)),
        compiler_params=pltpu.CompilerParams(**cparams),
        cost_estimate=pl.CostEstimate(
            flops=flops, transcendentals=0, bytes_accessed=bytes_accessed
        ),
    )(x2, dup)

    # (M, s*s*W) row-major is bit-identical to (B, C, s*H, s*W) row-major.
    return out2.reshape(B, C, s * H, s * W)


def _reference(x, s):
    B, C, H, W = x.shape
    return jnp.broadcast_to(
        x[:, :, :, None, :, None], (B, C, H, s, W, s)
    ).reshape(B, C, s * H, s * W)


if __name__ == "__main__":
    key = jax.random.PRNGKey(0)
    x = jax.random.normal(key, (2, 4, 16, 16), jnp.float32)     # NCHW, like PyTorch

    y = jax.block_until_ready(upsample_nearest(x, stride=2))
    ref = _reference(x, 2)

    assert y.shape == (2, 4, 32, 32)
    assert y.dtype == x.dtype
    assert bool(jnp.all(jnp.isfinite(y)))
    # The f32 path is designed to be bit-exact (3-way exact bf16 split), so a
    # tight tolerance is used; any indexing/layout bug is an O(1) mismatch.
    assert bool(jnp.allclose(y, ref, rtol=1e-6, atol=1e-6)), "mismatch vs reference"

    # Small odd-shaped case (W, H, M not multiples of the tile sizes).
    x2 = jax.random.normal(jax.random.PRNGKey(0), (1, 3, 5, 7), jnp.float32)
    y2 = jax.block_until_ready(upsample_nearest(x2, stride=2))
    assert y2.shape == (1, 3, 10, 14)
    assert bool(jnp.allclose(y2, _reference(x2, 2), rtol=1e-6, atol=1e-6))

    print("KERNEL_OK")
</pallas_src>

<mosaic_0001>
module attributes {stable_mosaic.version = 11 : i64} {
  func.func @_upsample_kernel(%arg0: i32, %arg1: memref<128x16xf32, #tpu.memory_space<vmem>>, %arg2: memref<16x64xbf16, #tpu.memory_space<vmem>>, %arg3: memref<128x64xf32, #tpu.memory_space<vmem>>) attributes {dimension_semantics = [#tpu.dimension_semantics<parallel>], iteration_bounds = array<i64: 1>, scalar_prefetch = 0 : i64, scratch_operands = 0 : i64, tpu.core_type = #tpu.core_type<tc>, window_params = [{transform_indices = @transform_0, window_bounds = array<i64: 128, 16>}, {pipeline_mode = #tpu.pipeline_mode<synchronous>, transform_indices = @transform_1, window_bounds = array<i64: 16, 64>}, {transform_indices = @transform_2, window_bounds = array<i64: 128, 64>}]} {
    %c0 = arith.constant 0 : index
    %c0_0 = arith.constant 0 : index
    %0 = vector.load %arg1[%c0, %c0_0] : memref<128x16xf32, #tpu.memory_space<vmem>>, vector<128x16xf32>
    %c0_1 = arith.constant 0 : index
    %c0_2 = arith.constant 0 : index
    %1 = vector.load %arg2[%c0_1, %c0_2] : memref<16x64xbf16, #tpu.memory_space<vmem>>, vector<16x64xbf16>
    %2 = arith.truncf %0 : vector<128x16xf32> to vector<128x16xbf16>
    %3 = arith.extf %2 : vector<128x16xbf16> to vector<128x16xf32>
    %4 = arith.subf %0, %3 : vector<128x16xf32>
    %5 = arith.truncf %4 : vector<128x16xf32> to vector<128x16xbf16>
    %6 = arith.extf %5 : vector<128x16xbf16> to vector<128x16xf32>
    %7 = arith.subf %4, %6 : vector<128x16xf32>
    %8 = arith.truncf %7 : vector<128x16xf32> to vector<128x16xbf16>
    %cst = arith.constant dense<0.000000e+00> : vector<128x64xf32>
    %9 = tpu.matmul %2, %1, %cst {dimension_numbers = #tpu.dot_dimension_numbers<[1], [0], [0], [1], [0, 0, 1, 1], [], []>} : vector<128x16xbf16>, vector<16x64xbf16>, vector<128x64xf32> -> vector<128x64xf32>
    %cst_3 = arith.constant dense<0.000000e+00> : vector<128x64xf32>
    %10 = tpu.matmul %5, %1, %cst_3 {dimension_numbers = #tpu.dot_dimension_numbers<[1], [0], [0], [1], [0, 0, 1, 1], [], []>} : vector<128x16xbf16>, vector<16x64xbf16>, vector<128x64xf32> -> vector<128x64xf32>
    %11 = arith.addf %9, %10 : vector<128x64xf32>
    %cst_4 = arith.constant dense<0.000000e+00> : vector<128x64xf32>
    %12 = tpu.matmul %8, %1, %cst_4 {dimension_numbers = #tpu.dot_dimension_numbers<[1], [0], [0], [1], [0, 0, 1, 1], [], []>} : vector<128x16xbf16>, vector<16x64xbf16>, vector<128x64xf32> -> vector<128x64xf32>
    %13 = arith.addf %11, %12 : vector<128x64xf32>
    %c0_5 = arith.constant 0 : index
    %c0_6 = arith.constant 0 : index
    %14 = vector.load %arg3[%c0_5, %c0_6] : memref<128x64xf32, #tpu.memory_space<vmem>>, vector<128x64xf32>
    tpu.vector_store %arg3[%c0_5, %c0_6], %13 {strides = array<i32>} : memref<128x64xf32, #tpu.memory_space<vmem>>, vector<128x64xf32>,
    return
  }
  func.func @transform_0(%arg0: i32) -> (i32, i32) {
    %c0_i32 = arith.constant 0 : i32
    %c0_i32_0 = arith.constant 0 : i32
    return %arg0, %c0_i32 : i32, i32
  }
  func.func @transform_1(%arg0: i32) -> (i32, i32) {
    %c0_i32 = arith.constant 0 : i32
    %c0_i32_0 = arith.constant 0 : i32
    %c0_i32_1 = arith.constant 0 : i32
    return %c0_i32, %c0_i32_0 : i32, i32
  }
  func.func @transform_2(%arg0: i32) -> (i32, i32) {
    %c0_i32 = arith.constant 0 : i32
    %c0_i32_0 = arith.constant 0 : i32
    return %arg0, %c0_i32 : i32, i32
  }
}

</mosaic_0001>

<bundles_post_ra>
// kernel: upsample_nearest.1
= control target key start
LH: loop header
LB: loop body
LE: loop exit
PB: predicated region body
PF: predicated region fallthrough
CT: control target
= control target key end

     0   :  { %7 = vsyncpa [#allocation3], 0  ;;  %s708_s9 = smov [#allocation2]   ;;  %s844_s0 = inlined_call_operand.hbm [shape: f32[128,16], index: 0, kind: input, shape index: {}]   ;;  %s845_s1 = inlined_call_operand.vmem [shape: bf16[16,64], index: 1, kind: input, shape index: {}]   ;;  %s846_s2 = inlined_call_operand.vmem [shape: f32[128,64], index: 2, kind: output, shape index: {}]  }
   0x1   :  { %s13_s10 = sshll.u32 %s708_s9, 4  ;;  %s684_s13 = scalar_lea.hbm %s844_s0, 2048  ;;  %s14_s10 = int_to_ptr.vmem [resolvable:$true] %s13_s10 }
   0x2   :  { %p685_p0 = scmp.ne.s32.totalorder %s844_s0, %s684_s13  ;;  %p688_p1 = scmp.lt.u32.totalorder %s684_s13, %s844_s0 }
   0x4   :  { %p690_p2 = pnand %p688_p1, %p685_p0 }
   0x6   :  { %693 = shalt.err (!%p690_p2)
}
   0x7   :  { %s694_s18 = scalar_lea.vmem %s14_s10, 2048  ;;  %p699_p4 = scmp.lt.s32.totalorder %s14_s10, %s14_s10 }
   0x8   :  { %p695_p3 = scmp.ne.s32.totalorder %s14_s10, %s694_s18  ;;  %p700_p5 = scmp.lt.s32.totalorder %s694_s18, %s694_s18 }
   0xa   :  { %p701_p6 = por %p700_p5, %p699_p4 }
   0xc   :  { %p702_p7 = pnand %p701_p6, %p695_p3 }
   0xe   :  { %705 = shalt.err (!%p702_p7)
}
   0xf   :  { %s709_s19 = smov 128   ;;  %s710_s20 = smov 8  }
  0x10   :  { %19 = dma.hbm_to_vmem [thread:$0]  %s844_s0, 2048, %s14_s10, [#allocation3], %s709_s19, %s709_s19, %s710_s20  }
  0x11   :  { %706 = dma.done.wait [#allocation3], 2048  }
  0x12   :  { %707 = vsyncadd [#allocation3], 4294965248  ;;  %v683_v0 = vld [vmem:[%s845_s1] sm:$0xff]   ;;  %v27_v2 = vld [vmem:[#allocation2 + $0x8] sm:$0xff]  ;;  %vm138_vm0 = vcmask 130048   ;;  %vm518_vm1 = vcmask 523264  }
  0x13   :  { %v26_v1 = vld [vmem:[#allocation2] sm:$0xff]  ;;  %v28_v3 = vld [vmem:[#allocation2 + $0x10] sm:$0xff]  ;;  %610 = vmatprep.subr.bf16.mxu0 %v683_v0  ;;  %592 = vmatprep.subr.bf16.mxu1 %v683_v0  ;;  %v29_v5 = vld [vmem:[#allocation2 + $0x18] sm:$0xff] }
  0x14   :  { %v44_v4 = vpack.c.bf16 %v27_v2, %v26_v1  ;;  %v30_v6 = vld [vmem:[#allocation2 + $0x20] sm:$0xff]  ;;  %v31_v7 = vld [vmem:[#allocation2 + $0x28] sm:$0xff]  ;;  %611 = vmatpush3.bf16.msra.mxu0 %v683_v0  ;;  %593 = vmatpush3.bf16.msra.mxu1 %v683_v0  ;;  %v45_v8 = vpack.c.bf16 %v29_v5, %v28_v3  ;;  %v32_v10 = vld [vmem:[#allocation2 + $0x30] sm:$0xff] }
  0x15   :  { %v46_v9 = vpack.c.bf16 %v31_v7, %v30_v6  ;;  %v33_v11 = vld [vmem:[#allocation2 + $0x38] sm:$0xff]  ;;  %646 = vmatprep.subr.bf16.mxu1 %v683_v0  ;;  %628 = vmatprep.subr.bf16.mxu0 %v683_v0  ;;  %v34_v19 = vld [vmem:[#allocation2 + $0x40] sm:$0xff]  ;;  %v35_v24 = vld [vmem:[#allocation2 + $0x48] sm:$0xff] }
  0x16   :  { %612 = vmatprep.mubr.msk.bf16.mxu0 %vm138_vm0, %v44_v4  ;;  %v52_v12 = vunpack.c.l.bf16 %v44_v4  ;;  %v53_v13 = vunpack.c.h.bf16 %v44_v4  ;;  %v47_v14 = vpack.c.bf16 %v33_v11, %v32_v10  ;;  %v54_v15 = vunpack.c.l.bf16 %v45_v8  ;;  %v36_v25 = vld [vmem:[#allocation2 + $0x50] sm:$0xff]  ;;  %v37_v26 = vld [vmem:[#allocation2 + $0x58] sm:$0xff]  ;;  %v38_v36 = vld [vmem:[#allocation2 + $0x60] sm:$0xff] }
  0x17   :  { %v55_v16 = vunpack.c.h.bf16 %v45_v8  ;;  %v56_v17 = vunpack.c.l.bf16 %v46_v9  ;;  %v57_v18 = vunpack.c.h.bf16 %v46_v9  ;;  %613 = vmatmul.mubr.msk.bf16.vlgmr.msra.gmra.mrb[0].mxu0 %vm138_vm0, %v45_v8  ;;  %v744_v34 = vpack.c.bf16 %v35_v24, %v34_v19  ;;  %v39_v37 = vld [vmem:[#allocation2 + $0x68] sm:$0xff]  ;;  %v40_v59 = vld [vmem:[#allocation2 + $0x70] sm:$0xff]  ;;  %v41_v60 = vld [vmem:[#allocation2 + $0x78] sm:$0xff] }
  0x18   :  { %v68_v20 = vsub.f32 %v26_v1, %v52_v12  ;;  %v69_v21 = vsub.f32 %v27_v2, %v53_v13  ;;  %v58_v22 = vunpack.c.l.bf16 %v47_v14  ;;  %v59_v23 = vunpack.c.h.bf16 %v47_v14  ;;  %629 = vmatpush3.bf16.msra.mxu0 %v683_v0  ;;  %616 = vmatprep.mubr.msk.bf16.mxu0 %vm138_vm0, %v46_v9 }
  0x19   :  { %v70_v27 = vsub.f32 %v28_v3, %v54_v15  ;;  %v71_v28 = vsub.f32 %v29_v5, %v55_v16  ;;  %v72_v29 = vsub.f32 %v30_v6, %v56_v17  ;;  %v73_v31 = vsub.f32 %v31_v7, %v57_v18 }
  0x1a   :  { %v84_v30 = vpack.c.bf16 %v69_v21, %v68_v20  ;;  %v74_v33 = vsub.f32 %v32_v10, %v58_v22  ;;  %v746_v35 = vpack.c.bf16 %v37_v26, %v36_v25  ;;  %v75_v41 = vsub.f32 %v33_v11, %v59_v23 }
  0x1b   :  { %v85_v32 = vpack.c.bf16 %v71_v28, %v70_v27  ;;  %v86_v40 = vpack.c.bf16 %v73_v31, %v72_v29  ;;  %v60_v44 = vunpack.c.l.bf16 %v744_v34  ;;  %v61_v45 = vunpack.c.h.bf16 %v744_v34 }
  0x1c   :  { %v92_v38 = vunpack.c.l.bf16 %v84_v30  ;;  %v93_v39 = vunpack.c.h.bf16 %v84_v30  ;;  %594 = vmatprep.mubr.msk.bf16.mxu1 %vm138_vm0, %v84_v30  ;;  %v753_v48 = vpack.c.bf16 %v39_v37, %v38_v36  ;;  %v62_v51 = vunpack.c.l.bf16 %v746_v35 }
  0x1d   :  { %v94_v42 = vunpack.c.l.bf16 %v85_v32  ;;  %v95_v43 = vunpack.c.h.bf16 %v85_v32  ;;  %595 = vmatmul.mubr.msk.bf16.vlgmr.msra.gmra.mrb[0].mxu1 %vm138_vm0, %v85_v32  ;;  %v76_v49 = vsub.f32 %v34_v19, %v60_v44  ;;  %v77_v50 = vsub.f32 %v35_v24, %v61_v45 }
  0x1e   :  { %v108_v46 = vsub.f32 %v68_v20, %v92_v38  ;;  %v109_v47 = vsub.f32 %v69_v21, %v93_v39  ;;  %647 = vmatpush3.bf16.msra.mxu1 %v683_v0  ;;  %598 = vmatprep.mubr.msk.bf16.mxu1 %vm138_vm0, %v86_v40  ;;  %v96_v55 = vunpack.c.l.bf16 %v86_v40  ;;  %v87_v56 = vpack.c.bf16 %v75_v41, %v74_v33 }
  0x1f   :  { %v110_v52 = vsub.f32 %v70_v27, %v94_v42  ;;  %v111_v53 = vsub.f32 %v71_v28, %v95_v43  ;;  %617 = vmatmul.mubr.msk.bf16.gmra.mrb[4].mxu0 %vm138_vm0, %v47_v14  ;;  %v63_v57 = vunpack.c.h.bf16 %v746_v35  ;;  %v97_v58 = vunpack.c.h.bf16 %v86_v40 }
  0x20   :  { %v124_v54 = vpack.c.bf16 %v109_v47, %v108_v46  ;;  %v88_v61 = vpack.c.bf16 %v77_v50, %v76_v49  ;;  %v112_v62 = vsub.f32 %v72_v29, %v96_v55  ;;  %v64_v63 = vunpack.c.l.bf16 %v753_v48 }
  0x21   :  { %v78_v0 = vsub.f32 %v36_v25, %v62_v51  ;;  %v113_v1 = vsub.f32 %v73_v31, %v97_v58  ;;  %v65_v2 = vunpack.c.h.bf16 %v753_v48  ;;  %v125_v3 = vpack.c.bf16 %v111_v53, %v110_v52 }
  0x22   :  { %630 = vmatprep.mubr.msk.bf16.mxu0 %vm138_vm0, %v124_v54  ;;  %v98_v4 = vunpack.c.l.bf16 %v87_v56  ;;  %v99_v5 = vunpack.c.h.bf16 %v87_v56  ;;  %v51_v6 = vpack.c.bf16 %v41_v60, %v40_v59  ;;  %v79_v7 = vsub.f32 %v37_v26, %v63_v57 }
  0x23   :  { %v126_v8 = vpack.c.bf16 %v113_v1, %v112_v62  ;;  %v100_v9 = vunpack.c.l.bf16 %v88_v61  ;;  %v101_v10 = vunpack.c.h.bf16 %v88_v61  ;;  %v80_v11 = vsub.f32 %v38_v36, %v64_v63 }
  0x24   :  { %v81_v12 = vsub.f32 %v39_v37, %v65_v2  ;;  %v114_v13 = vsub.f32 %v74_v33, %v98_v4  ;;  %v115_v14 = vsub.f32 %v75_v41, %v99_v5  ;;  %v66_v15 = vunpack.c.l.bf16 %v51_v6 }
  0x25   :  { %599 = vmatmul.mubr.msk.bf16.gmra.mrb[4].mxu1 %vm138_vm0, %v87_v56  ;;  %v89_v16 = vpack.c.bf16 %v79_v7, %v78_v0  ;;  %v67_v17 = vunpack.c.h.bf16 %v51_v6  ;;  %v116_v18 = vsub.f32 %v76_v49, %v100_v9  ;;  %v117_v19 = vsub.f32 %v77_v50, %v101_v10 }
  0x26   :  { %602 = vmatprep.mubr.msk.bf16.mxu1 %vm138_vm0, %v88_v61  ;;  %v90_v20 = vpack.c.bf16 %v81_v12, %v80_v11  ;;  %v127_v21 = vpack.c.bf16 %v115_v14, %v114_v13  ;;  %v82_v22 = vsub.f32 %v40_v59, %v66_v15 }
  0x27   :  { %631 = vmatmul.mubr.msk.bf16.vlgmr.msra.gmra.mrb[0].mxu0 %vm138_vm0, %v125_v3  ;;  %v102_v23 = vunpack.c.l.bf16 %v89_v16  ;;  %v103_v24 = vunpack.c.h.bf16 %v89_v16  ;;  %v83_v25 = vsub.f32 %v41_v60, %v67_v17  ;;  %v128_v26 = vpack.c.bf16 %v117_v19, %v116_v18 }
  0x28   :  { %634 = vmatprep.mubr.msk.bf16.mxu0 %vm138_vm0, %v126_v8  ;;  %v104_v27 = vunpack.c.l.bf16 %v90_v20  ;;  %v105_v28 = vunpack.c.h.bf16 %v90_v20 }
  0x29   :  { %v118_v29 = vsub.f32 %v78_v0, %v102_v23  ;;  %v119_v30 = vsub.f32 %v79_v7, %v103_v24  ;;  %v91_v31 = vpack.c.bf16 %v83_v25, %v82_v22 }
  0x2a   :  { %v120_v32 = vsub.f32 %v80_v11, %v104_v27  ;;  %v121_v33 = vsub.f32 %v81_v12, %v105_v28 }
  0x2b   :  { %v129_v36 = vpack.c.bf16 %v119_v30, %v118_v29  ;;  %v106_v37 = vunpack.c.l.bf16 %v91_v31  ;;  %v107_v38 = vunpack.c.h.bf16 %v91_v31 }
  0x2c   :  { %v130_v39 = vpack.c.bf16 %v121_v33, %v120_v32 }
  0x2d   :  { %603 = vmatmul.mubr.msk.bf16.gmra.mrb[8].mxu1 %vm138_vm0, %v89_v16  ;;  %v122_v40 = vsub.f32 %v82_v22, %v106_v37  ;;  %v123_v41 = vsub.f32 %v83_v25, %v107_v38 }
  0x2e   :  { %606 = vmatprep.mubr.msk.bf16.mxu1 %vm138_vm0, %v90_v20 }
  0x2f   :  { %635 = vmatmul.mubr.msk.bf16.gmra.mrb[4].mxu0 %vm138_vm0, %v127_v21  ;;  %v131_v42 = vpack.c.bf16 %v123_v41, %v122_v40 }
  0x30   :  { %638 = vmatprep.mubr.msk.bf16.mxu0 %vm138_vm0, %v128_v26 }
  0x35   :  { %607 = vmatmul.mubr.msk.bf16.gmra.mrb[12].mxu1 %vm138_vm0, %v91_v31 }
  0x36   :  { %620 = vmatprep.mubr.msk.bf16.mxu1 %vm138_vm0, %v744_v34 }
  0x37   :  { %639 = vmatmul.mubr.msk.bf16.gmra.mrb[8].mxu0 %vm138_vm0, %v129_v36 }
  0x38   :  { %642 = vmatprep.mubr.msk.bf16.mxu0 %vm138_vm0, %v130_v39 }
  0x3d   :  { %621 = vmatmul.mubr.msk.bf16.vlgmr.msra.gmra.mrb[8].mxu1 %vm138_vm0, %v746_v35 }
  0x3e   :  { %624 = vmatprep.mubr.msk.bf16.mxu1 %vm138_vm0, %v753_v48 }
  0x3f   :  { %643 = vmatmul.mubr.msk.bf16.gmra.mrb[12].mxu0 %vm138_vm0, %v131_v42 }
  0x45   :  { %625 = vmatmul.mubr.msk.bf16.gmra.mrb[12].mxu1 %vm138_vm0, %v51_v6 }
  0xf0   :  { %v596_v43 = vpop.f32.mrb[0].mxu1 }
  0xf1   :  { %v197_v44 = vpop.f32.mrb[1].mxu1 }
  0xf2   :  { %v597_v34 = vpop.f32.mrb[2].mxu1 }
  0xf3   :  { %v200_v45 = vpop.f32.mrb[3].mxu1 }
  0xf8   :  { %v600_v46 = vpop.f32.mrb[4].mxu1 }
  0xf9   :  { %v213_v47 = vpop.f32.mrb[5].mxu1 }
  0xfa   :  { %v601_v49 = vpop.f32.mrb[6].mxu1  ;;  %v632_v51 = vpop.f32.mrb[0].mxu0 }
  0xfb   :  { %v216_v50 = vpop.f32.mrb[7].mxu1  ;;  %v648_v52 = vadd.f32 %v632_v51, %v596_v43  ;;  %v439_v53 = vpop.f32.mrb[1].mxu0 }
  0xfc   :  { %v649_v35 = vadd.f32 %v439_v53, %v197_v44  ;;  %v633_v54 = vpop.f32.mrb[2].mxu0 }
  0xfd   :  { %521 = vst.msk [vmem:[%s846_s2 + $0x10] sm:$0xff] %vm518_vm1, %v648_v52  ;;  %v650_v48 = vadd.f32 %v633_v54, %v597_v34  ;;  %v442_v55 = vpop.f32.mrb[3].mxu0 }
  0xfe   :  { %519 = vst.msk [vmem:[%s846_s2] sm:$0xff] %vm518_vm1, %v649_v35  ;;  %v651_v56 = vadd.f32 %v442_v55, %v200_v45 }
  0xff   :  { %522 = vst.msk [vmem:[%s846_s2 + $0x18] sm:$0xff] %vm518_vm1, %v650_v48 }
 0x100   :  { %520 = vst.msk [vmem:[%s846_s2 + $0x8] sm:$0xff] %vm518_vm1, %v651_v56 }
 0x102   :  { %v636_v57 = vpop.f32.mrb[4].mxu0 }
 0x103   :  { %v652_v58 = vadd.f32 %v636_v57, %v600_v46  ;;  %v455_v59 = vpop.f32.mrb[5].mxu0 }
 0x104   :  { %v653_v60 = vadd.f32 %v455_v59, %v213_v47  ;;  %v637_v61 = vpop.f32.mrb[6].mxu0 }
 0x105   :  { %525 = vst.msk [vmem:[%s846_s2 + $0x30] sm:$0xff] %vm518_vm1, %v652_v58  ;;  %v654_v62 = vadd.f32 %v637_v61, %v601_v49  ;;  %v458_v63 = vpop.f32.mrb[7].mxu0 }
 0x106   :  { %523 = vst.msk [vmem:[%s846_s2 + $0x20] sm:$0xff] %vm518_vm1, %v653_v60  ;;  %v655_v0 = vadd.f32 %v458_v63, %v216_v50 }
 0x107   :  { %526 = vst.msk [vmem:[%s846_s2 + $0x38] sm:$0xff] %vm518_vm1, %v654_v62 }
 0x108   :  { %524 = vst.msk [vmem:[%s846_s2 + $0x28] sm:$0xff] %vm518_vm1, %v655_v0 }
 0x10a   :  { %v640_v1 = vpop.f32.mrb[8].mxu0 }
 0x10b   :  { %v471_v2 = vpop.f32.mrb[9].mxu0 }
 0x10c   :  { %v641_v3 = vpop.f32.mrb[10].mxu0 }
 0x10d   :  { %v474_v4 = vpop.f32.mrb[11].mxu0 }
 0x110   :  { %v622_v5 = vpop.f32.mrb[8].mxu1 }
 0x111   :  { %v656_v6 = vadd.f32 %v640_v1, %v622_v5  ;;  %v350_v7 = vpop.f32.mrb[9].mxu1 }
 0x112   :  { %v657_v8 = vadd.f32 %v471_v2, %v350_v7  ;;  %v623_v9 = vpop.f32.mrb[10].mxu1  ;;  %v644_v12 = vpop.f32.mrb[12].mxu0 }
 0x113   :  { %529 = vst.msk [vmem:[%s846_s2 + $0x50] sm:$0xff] %vm518_vm1, %v656_v6  ;;  %v658_v10 = vadd.f32 %v641_v3, %v623_v9  ;;  %v353_v11 = vpop.f32.mrb[11].mxu1  ;;  %v487_v14 = vpop.f32.mrb[13].mxu0 }
 0x114   :  { %527 = vst.msk [vmem:[%s846_s2 + $0x40] sm:$0xff] %vm518_vm1, %v657_v8  ;;  %v659_v13 = vadd.f32 %v474_v4, %v353_v11  ;;  %v645_v15 = vpop.f32.mrb[14].mxu0 }
 0x115   :  { %530 = vst.msk [vmem:[%s846_s2 + $0x58] sm:$0xff] %vm518_vm1, %v658_v10  ;;  %v490_v16 = vpop.f32.mrb[15].mxu0 }
 0x116   :  { %528 = vst.msk [vmem:[%s846_s2 + $0x48] sm:$0xff] %vm518_vm1, %v659_v13 }
 0x118   :  { %v626_v17 = vpop.f32.mrb[12].mxu1 }
 0x119   :  { %v660_v18 = vadd.f32 %v644_v12, %v626_v17  ;;  %v366_v19 = vpop.f32.mrb[13].mxu1 }
 0x11a   :  { %v661_v20 = vadd.f32 %v487_v14, %v366_v19  ;;  %v627_v21 = vpop.f32.mrb[14].mxu1 }
 0x11b   :  { %533 = vst.msk [vmem:[%s846_s2 + $0x70] sm:$0xff] %vm518_vm1, %v660_v18  ;;  %v662_v22 = vadd.f32 %v645_v15, %v627_v21  ;;  %v369_v23 = vpop.f32.mrb[15].mxu1 }
 0x11c   :  { %531 = vst.msk [vmem:[%s846_s2 + $0x60] sm:$0xff] %vm518_vm1, %v661_v20  ;;  %v663_v24 = vadd.f32 %v490_v16, %v369_v23 }
 0x11d   :  { %534 = vst.msk [vmem:[%s846_s2 + $0x78] sm:$0xff] %vm518_vm1, %v662_v22 }
 0x11e   :  { %532 = vst.msk [vmem:[%s846_s2 + $0x68] sm:$0xff] %vm518_vm1, %v663_v24 }
 0x11f   :  { %539 = vsyncpa [#allocation3], 1 }

</bundles_post_ra>
